<compile_context>
chip_gen: v6e
topology: v6e:2x2x1
jax: 0.10.0
libtpu: 0.0.40
codegen_flags: <defaults>
</compile_context>

<pallas_src>
import functools
import math

import jax
import jax.numpy as jnp
from jax.experimental import pallas as pl
from jax.experimental.pallas import tpu as pltpu


# ----------------------------- config (small) -------------------------------
class Config:
    d_model = 32
    d_kv = 8
    num_heads = 4
    dropout_rate = 0.0  # eval-mode / p=0 -> dropout is a no-op
    relative_attention_num_buckets = 32
    relative_attention_max_distance = 128
    custom_relative_attention = False
    layer_norm_epsilon = 1e-6


# ------------------------- relative position bias ---------------------------
def _relative_position_bucket(relative_position, num_buckets_total, max_distance):
    """Matches T5Attention._relative_position_bucket exactly."""
    num_buckets = num_buckets_total // 2
    relative_buckets = (relative_position > 0).astype(jnp.int32) * num_buckets
    relative_position = jnp.abs(relative_position)
    max_exact = num_buckets // 2
    is_small = relative_position < max_exact
    # guard rel==0 so log(0) never appears (that branch is masked by is_small anyway)
    rel_for_log = jnp.maximum(relative_position, 1).astype(jnp.float32)
    rel_if_large = max_exact + (
        jnp.log(rel_for_log / max_exact)
        / math.log(max_distance / max_exact)
        * (num_buckets - max_exact)
    ).astype(jnp.int32)
    rel_if_large = jnp.minimum(rel_if_large, num_buckets - 1)
    relative_buckets = relative_buckets + jnp.where(is_small, relative_position, rel_if_large)
    return relative_buckets


def compute_bias(context_position, memory_position, rel_bias_table, cfg):
    """[B, Lq], [B, Lk], table [num_buckets, H] -> [B, H, Lq, Lk]."""
    rel_pos = memory_position[:, None, :] - context_position[:, :, None]  # [B, Lq, Lk]
    buckets = _relative_position_bucket(
        rel_pos, cfg.relative_attention_num_buckets, cfg.relative_attention_max_distance
    )
    values = rel_bias_table[buckets]              # [B, Lq, Lk, H]  (embedding gather)
    return jnp.transpose(values, (0, 3, 1, 2))    # [B, H, Lq, Lk]


# ------------------------------ Pallas kernel --------------------------------
def _t5_self_attn_kernel(x_ref, bias_ref, mask_ref, lnw_ref,
                         wq_ref, wk_ref, wv_ref, wo_ref, out_ref,
                         *, H, eps, mxu_dtype):
    # x_ref: [L, D] rows of one batch element (lane-dense 2-D block)
    x = x_ref[...].astype(jnp.float32)

    # --- T5LayerNorm (RMS norm, no mean subtraction), f32 math ---
    var = jnp.mean(x * x, axis=-1, keepdims=True)
    xn = (x * jax.lax.rsqrt(var + eps) * lnw_ref[...]).astype(mxu_dtype)   # [L, D]

    # --- key-mask penalty for this batch element (bias is batch-shared) ---
    pen = -1000.0 * (1.0 - mask_ref[0].astype(jnp.float32))                # [1, L]

    acc = jnp.zeros(out_ref.shape, jnp.float32)                            # [L, D]

    # Per-head loop: all per-head weights reached via leading-axis ref indexing
    # (no lane slicing / stacking / concatenation).  All matmuls are rank-2.
    for h in range(H):
        q = jnp.dot(xn, wq_ref[h], preferred_element_type=jnp.float32)     # [L, dkv]
        k = jnp.dot(xn, wk_ref[h], preferred_element_type=jnp.float32)
        v = jnp.dot(xn, wv_ref[h], preferred_element_type=jnp.float32)

        # scores: q @ k^T without materialising a transpose (T5: no 1/sqrt(d) scaling)
        s = jax.lax.dot_general(
            q.astype(mxu_dtype), k.astype(mxu_dtype),
            dimension_numbers=(((1,), (1,)), ((), ())),
            preferred_element_type=jnp.float32)                            # [L, L]
        s = s + bias_ref[h] + pen

        # softmax over keys (f32), normalise with one approx reciprocal (EUP slot)
        m = jnp.max(s, axis=-1, keepdims=True)
        e = jnp.exp(s - m)
        p = e * pl.reciprocal(jnp.sum(e, axis=-1, keepdims=True), approx=True)

        ctx = jnp.dot(p.astype(mxu_dtype), v.astype(mxu_dtype),
                      preferred_element_type=jnp.float32)                  # [L, dkv]
        # per-head partial output projection, accumulated in f32
        acc = acc + jnp.dot(ctx.astype(mxu_dtype), wo_ref[h],
                            preferred_element_type=jnp.float32)            # [L, D]

    # NOTE: the provided spec returns dropout(attn_output) WITHOUT a residual add.
    out_ref[...] = acc.astype(out_ref.dtype)


def t5_layer_self_attention_pallas(hidden, positions, mask, params, cfg,
                                   mxu_dtype=jnp.float32):
    """hidden [B, L, d_model] f32, positions [B, L] i32, mask [B, L] f32."""
    B, L, D = hidden.shape
    H, dkv = cfg.num_heads, cfg.d_kv

    # De-duplicated position bias: positions are shared across the batch for T5
    # self-attention, so compute a single [H, L, L] bias (no O(B*H*L^2) stream).
    bias = compute_bias(positions[:1], positions[:1], params["rel_bias"], cfg)[0]
    bias = bias.astype(jnp.float32)                                # [H, L, L]

    # Tiny per-batch key mask; penalty is applied inside the kernel.
    mask3 = mask.reshape(B, 1, L).astype(jnp.float32)              # [B, 1, L]

    # Per-head weight layout so the head "split" is pure ref indexing in-kernel.
    # nn.Linear stores weight as [out, in]; out features are ordered (head, dim).
    def per_head_in(w):                       # [H*dkv, D] -> [H, D, dkv]
        return jnp.transpose(w.reshape(H, dkv, D), (0, 2, 1)).astype(mxu_dtype)

    wq_h = per_head_in(params["wq"])
    wk_h = per_head_in(params["wk"])
    wv_h = per_head_in(params["wv"])
    wo_h = params["wo"].T.reshape(H, dkv, D).astype(mxu_dtype)     # [H, dkv, D]
    ln_w = params["ln_weight"].reshape(1, D).astype(jnp.float32)

    x2 = hidden.reshape(B * L, D)                                  # lane-dense 2-D input

    kernel = functools.partial(
        _t5_self_attn_kernel, H=H, eps=float(cfg.layer_norm_epsilon),
        mxu_dtype=mxu_dtype)

    out2 = pl.pallas_call(
        kernel,
        out_shape=jax.ShapeDtypeStruct((B * L, D), hidden.dtype),  # lane-dense 2-D output
        grid_spec=pltpu.PrefetchScalarGridSpec(
            num_scalar_prefetch=0,
            grid=(B,),                                             # parallel over batch (v7x: 2 TCs)
            in_specs=[
                pl.BlockSpec((L, D), lambda b: (b, 0)),            # hidden rows of batch b
                pl.BlockSpec((H, L, L), lambda b: (0, 0, 0)),      # shared bias (resident)
                pl.BlockSpec((1, 1, L), lambda b: (b, 0, 0)),      # key mask of batch b
                pl.BlockSpec((1, D), lambda b: (0, 0)),            # layer-norm weight
                pl.BlockSpec((H, D, dkv), lambda b: (0, 0, 0)),    # Wq per-head (resident)
                pl.BlockSpec((H, D, dkv), lambda b: (0, 0, 0)),    # Wk per-head (resident)
                pl.BlockSpec((H, D, dkv), lambda b: (0, 0, 0)),    # Wv per-head (resident)
                pl.BlockSpec((H, dkv, D), lambda b: (0, 0, 0)),    # Wo per-head (resident)
            ],
            out_specs=pl.BlockSpec((L, D), lambda b: (b, 0)),
        ),
        compiler_params=pltpu.CompilerParams(dimension_semantics=("parallel",)),
    )(x2, bias, mask3, ln_w, wq_h, wk_h, wv_h, wo_h)

    return out2.reshape(B, L, D)


# ---------------------------- pure-JAX reference -----------------------------
def t5_layer_self_attention_ref(hidden, positions, mask, params, cfg):
    B, L, D = hidden.shape
    H, dkv = cfg.num_heads, cfg.d_kv

    # T5LayerNorm
    x = hidden.astype(jnp.float32)
    var = jnp.mean(x * x, axis=-1, keepdims=True)
    xn = (x * jax.lax.rsqrt(var + cfg.layer_norm_epsilon) * params["ln_weight"]).astype(hidden.dtype)

    def shape(t):  # [B, L, inner] -> [B, H, L, dkv]
        return jnp.transpose(t.reshape(B, L, H, dkv), (0, 2, 1, 3))

    q = shape(xn @ params["wq"].T).astype(jnp.float32)
    k = shape(xn @ params["wk"].T).astype(jnp.float32)
    v = shape(xn @ params["wv"].T).astype(jnp.float32)

    scores = jnp.einsum("bhqd,bhkd->bhqk", q, k)
    bias = compute_bias(positions, positions, params["rel_bias"], cfg).astype(jnp.float32)
    bias = bias - 1000.0 * (1.0 - mask[:, None, None, :].astype(jnp.float32))
    attn = jax.nn.softmax(scores + bias, axis=-1)
    ctx = jnp.einsum("bhqk,bhkd->bhqd", attn, v)
    ctx = jnp.transpose(ctx, (0, 2, 1, 3)).reshape(B, L, H * dkv).astype(hidden.dtype)
    return ctx @ params["wo"].T       # spec: no residual add, dropout p=0 is a no-op


# ----------------------------------- main ------------------------------------
if __name__ == "__main__":
    cfg = Config()
    B, L = 2, 8
    D, inner = cfg.d_model, cfg.num_heads * cfg.d_kv

    key = jax.random.PRNGKey(0)
    ks = jax.random.split(key, 8)
    params = {
        "wq": 0.02 * jax.random.normal(ks[0], (inner, D), jnp.float32),   # nn.Linear [out, in]
        "wk": 0.02 * jax.random.normal(ks[1], (inner, D), jnp.float32),
        "wv": 0.02 * jax.random.normal(ks[2], (inner, D), jnp.float32),
        "wo": 0.02 * jax.random.normal(ks[3], (D, inner), jnp.float32),
        "rel_bias": 0.02 * jax.random.normal(
            ks[4], (cfg.relative_attention_num_buckets, cfg.num_heads), jnp.float32),
        "ln_weight": 1.0 + 0.1 * jax.random.normal(ks[5], (D,), jnp.float32),
    }

    hidden = jax.random.normal(ks[6], (B, L, D), jnp.float32)
    positions = jnp.broadcast_to(jnp.arange(L, dtype=jnp.int32), (B, L))
    # mask out the last two keys of batch 1 to exercise the masking path
    mask = jnp.ones((B, L), jnp.float32).at[1, -2:].set(0.0)

    ref = t5_layer_self_attention_ref(hidden, positions, mask, params, cfg)

    # f32 MXU path (matches the PyTorch module's f32 math; only the softmax
    # denominator uses the approximate EUP reciprocal).
    out = t5_layer_self_attention_pallas(hidden, positions, mask, params, cfg,
                                         mxu_dtype=jnp.float32)
    out = jax.block_until_ready(out)
    assert out.shape == (B, L, D) and out.dtype == jnp.float32
    assert jnp.allclose(out, ref, atol=2e-4, rtol=2e-3), "f32 kernel mismatch vs reference"

    # bf16-at-the-MXU-boundary fast path: full-rate on v5e/v6e/v7x MXUs;
    # layer-norm, softmax and all accumulation remain f32.
    out_bf16 = t5_layer_self_attention_pallas(hidden, positions, mask, params, cfg,
                                              mxu_dtype=jnp.bfloat16)
    out_bf16 = jax.block_until_ready(out_bf16)
    assert jnp.allclose(out_bf16, ref, atol=2e-3, rtol=2e-2), "bf16 kernel mismatch vs reference"

    print("KERNEL_OK")
</pallas_src>

<mosaic_0001>
module attributes {stable_mosaic.version = 11 : i64} {
  func.func @_t5_self_attn_kernel(%arg0: i32, %arg1: memref<8x32xf32, #tpu.memory_space<vmem>>, %arg2: memref<4x8x8xf32, #tpu.memory_space<vmem>>, %arg3: memref<1x1x8xf32, #tpu.memory_space<vmem>>, %arg4: memref<1x32xf32, #tpu.memory_space<vmem>>, %arg5: memref<4x32x8xf32, #tpu.memory_space<vmem>>, %arg6: memref<4x32x8xf32, #tpu.memory_space<vmem>>, %arg7: memref<4x32x8xf32, #tpu.memory_space<vmem>>, %arg8: memref<4x8x32xf32, #tpu.memory_space<vmem>>, %arg9: memref<8x32xf32, #tpu.memory_space<vmem>>) attributes {dimension_semantics = [#tpu.dimension_semantics<parallel>], iteration_bounds = array<i64: 2>, scalar_prefetch = 0 : i64, scratch_operands = 0 : i64, tpu.core_type = #tpu.core_type<tc>, window_params = [{transform_indices = @transform_0, window_bounds = array<i64: 8, 32>}, {pipeline_mode = #tpu.pipeline_mode<synchronous>, transform_indices = @transform_1, window_bounds = array<i64: 4, 8, 8>}, {transform_indices = @transform_2, window_bounds = array<i64: 1, 1, 8>}, {pipeline_mode = #tpu.pipeline_mode<synchronous>, transform_indices = @transform_3, window_bounds = array<i64: 1, 32>}, {pipeline_mode = #tpu.pipeline_mode<synchronous>, transform_indices = @transform_4, window_bounds = array<i64: 4, 32, 8>}, {pipeline_mode = #tpu.pipeline_mode<synchronous>, transform_indices = @transform_5, window_bounds = array<i64: 4, 32, 8>}, {pipeline_mode = #tpu.pipeline_mode<synchronous>, transform_indices = @transform_6, window_bounds = array<i64: 4, 32, 8>}, {pipeline_mode = #tpu.pipeline_mode<synchronous>, transform_indices = @transform_7, window_bounds = array<i64: 4, 8, 32>}, {transform_indices = @transform_8, window_bounds = array<i64: 8, 32>}]} {
    %c0 = arith.constant 0 : index
    %c0_0 = arith.constant 0 : index
    %0 = vector.load %arg1[%c0, %c0_0] : memref<8x32xf32, #tpu.memory_space<vmem>>, vector<8x32xf32>
    %1 = arith.mulf %0, %0 : vector<8x32xf32>
    %cst = arith.constant dense<0.000000e+00> : vector<8xf32>
    %2 = vector.multi_reduction <add>, %1, %cst [1] : vector<8x32xf32> to vector<8xf32>
    %3 = vector.shape_cast %2 : vector<8xf32> to vector<8x1xf32>
    %cst_1 = arith.constant 3.200000e+01 : f32
    %4 = vector.broadcast %cst_1 : f32 to vector<8x1xf32>
    %5 = arith.divf %3, %4 : vector<8x1xf32>
    %cst_2 = arith.constant 9.99999997E-7 : f32
    %6 = vector.broadcast %cst_2 : f32 to vector<8x1xf32>
    %7 = arith.addf %5, %6 : vector<8x1xf32>
    %8 = math.rsqrt %7 : vector<8x1xf32>
    %9 = vector.broadcast %8 : vector<8x1xf32> to vector<8x32xf32>
    %10 = arith.mulf %0, %9 : vector<8x32xf32>
    %c0_3 = arith.constant 0 : index
    %c0_4 = arith.constant 0 : index
    %11 = vector.load %arg4[%c0_3, %c0_4] : memref<1x32xf32, #tpu.memory_space<vmem>>, vector<1x32xf32>
    %12 = vector.broadcast %11 : vector<1x32xf32> to vector<8x32xf32>
    %13 = arith.mulf %10, %12 : vector<8x32xf32>
    %c0_5 = arith.constant 0 : index
    %c0_6 = arith.constant 0 : index
    %c0_7 = arith.constant 0 : index
    %14 = vector.load %arg3[%c0_5, %c0_6, %c0_7] : memref<1x1x8xf32, #tpu.memory_space<vmem>>, vector<1x1x8xf32>
    %15 = vector.shape_cast %14 : vector<1x1x8xf32> to vector<1x8xf32>
    %cst_8 = arith.constant 1.000000e+00 : f32
    %16 = vector.broadcast %cst_8 : f32 to vector<1x8xf32>
    %17 = arith.subf %16, %15 : vector<1x8xf32>
    %cst_9 = arith.constant -1.000000e+03 : f32
    %18 = vector.broadcast %cst_9 : f32 to vector<1x8xf32>
    %19 = arith.mulf %18, %17 : vector<1x8xf32>
    %cst_10 = arith.constant 0.000000e+00 : f32
    %20 = vector.broadcast %cst_10 : f32 to vector<8x32xf32>
    %c0_11 = arith.constant 0 : index
    %c0_12 = arith.constant 0 : index
    %c0_13 = arith.constant 0 : index
    %21 = vector.load %arg5[%c0_11, %c0_12, %c0_13] : memref<4x32x8xf32, #tpu.memory_space<vmem>>, vector<1x32x8xf32>
    %22 = vector.shape_cast %21 : vector<1x32x8xf32> to vector<32x8xf32>
    %cst_14 = arith.constant dense<0.000000e+00> : vector<8x8xf32>
    %23 = tpu.matmul %13, %22, %cst_14 {dimension_numbers = #tpu.dot_dimension_numbers<[1], [0], [0], [1], [0, 0, 1, 1], [], []>} : vector<8x32xf32>, vector<32x8xf32>, vector<8x8xf32> -> vector<8x8xf32>
    %c0_15 = arith.constant 0 : index
    %c0_16 = arith.constant 0 : index
    %c0_17 = arith.constant 0 : index
    %24 = vector.load %arg6[%c0_15, %c0_16, %c0_17] : memref<4x32x8xf32, #tpu.memory_space<vmem>>, vector<1x32x8xf32>
    %25 = vector.shape_cast %24 : vector<1x32x8xf32> to vector<32x8xf32>
    %cst_18 = arith.constant dense<0.000000e+00> : vector<8x8xf32>
    %26 = tpu.matmul %13, %25, %cst_18 {dimension_numbers = #tpu.dot_dimension_numbers<[1], [0], [0], [1], [0, 0, 1, 1], [], []>} : vector<8x32xf32>, vector<32x8xf32>, vector<8x8xf32> -> vector<8x8xf32>
    %c0_19 = arith.constant 0 : index
    %c0_20 = arith.constant 0 : index
    %c0_21 = arith.constant 0 : index
    %27 = vector.load %arg7[%c0_19, %c0_20, %c0_21] : memref<4x32x8xf32, #tpu.memory_space<vmem>>, vector<1x32x8xf32>
    %28 = vector.shape_cast %27 : vector<1x32x8xf32> to vector<32x8xf32>
    %cst_22 = arith.constant dense<0.000000e+00> : vector<8x8xf32>
    %29 = tpu.matmul %13, %28, %cst_22 {dimension_numbers = #tpu.dot_dimension_numbers<[1], [0], [0], [1], [0, 0, 1, 1], [], []>} : vector<8x32xf32>, vector<32x8xf32>, vector<8x8xf32> -> vector<8x8xf32>
    %cst_23 = arith.constant dense<0.000000e+00> : vector<8x8xf32>
    %30 = tpu.matmul %23, %26, %cst_23 {dimension_numbers = #tpu.dot_dimension_numbers<[1], [1], [0], [0], [0, 0, 1, 0], [], []>} : vector<8x8xf32>, vector<8x8xf32>, vector<8x8xf32> -> vector<8x8xf32>
    %c0_24 = arith.constant 0 : index
    %c0_25 = arith.constant 0 : index
    %c0_26 = arith.constant 0 : index
    %31 = vector.load %arg2[%c0_24, %c0_25, %c0_26] : memref<4x8x8xf32, #tpu.memory_space<vmem>>, vector<1x8x8xf32>
    %32 = vector.shape_cast %31 : vector<1x8x8xf32> to vector<8x8xf32>
    %33 = arith.addf %30, %32 : vector<8x8xf32>
    %34 = vector.broadcast %19 : vector<1x8xf32> to vector<8x8xf32>
    %35 = arith.addf %33, %34 : vector<8x8xf32>
    %cst_27 = arith.constant dense<0xFF800000> : vector<8xf32>
    %36 = vector.multi_reduction <maximumf>, %35, %cst_27 [1] : vector<8x8xf32> to vector<8xf32>
    %37 = vector.shape_cast %36 : vector<8xf32> to vector<8x1xf32>
    %38 = vector.broadcast %37 : vector<8x1xf32> to vector<8x8xf32>
    %39 = arith.subf %35, %38 : vector<8x8xf32>
    %40 = math.exp %39 : vector<8x8xf32>
    %cst_28 = arith.constant dense<0.000000e+00> : vector<8xf32>
    %41 = vector.multi_reduction <add>, %40, %cst_28 [1] : vector<8x8xf32> to vector<8xf32>
    %42 = vector.shape_cast %41 : vector<8xf32> to vector<8x1xf32>
    %43 = tpu.reciprocal %42 {approx = true} : vector<8x1xf32> -> vector<8x1xf32>
    %44 = vector.broadcast %43 : vector<8x1xf32> to vector<8x8xf32>
    %45 = arith.mulf %40, %44 : vector<8x8xf32>
    %cst_29 = arith.constant dense<0.000000e+00> : vector<8x8xf32>
    %46 = tpu.matmul %45, %29, %cst_29 {dimension_numbers = #tpu.dot_dimension_numbers<[1], [0], [0], [1], [0, 0, 1, 1], [], []>} : vector<8x8xf32>, vector<8x8xf32>, vector<8x8xf32> -> vector<8x8xf32>
    %c0_30 = arith.constant 0 : index
    %c0_31 = arith.constant 0 : index
    %c0_32 = arith.constant 0 : index
    %47 = vector.load %arg8[%c0_30, %c0_31, %c0_32] : memref<4x8x32xf32, #tpu.memory_space<vmem>>, vector<1x8x32xf32>
    %48 = vector.shape_cast %47 : vector<1x8x32xf32> to vector<8x32xf32>
    %cst_33 = arith.constant dense<0.000000e+00> : vector<8x32xf32>
    %49 = tpu.matmul %46, %48, %cst_33 {dimension_numbers = #tpu.dot_dimension_numbers<[1], [0], [0], [1], [0, 0, 1, 1], [], []>} : vector<8x8xf32>, vector<8x32xf32>, vector<8x32xf32> -> vector<8x32xf32>
    %50 = arith.addf %20, %49 : vector<8x32xf32>
    %c1 = arith.constant 1 : index
    %c0_34 = arith.constant 0 : index
    %c0_35 = arith.constant 0 : index
    %51 = vector.load %arg5[%c1, %c0_34, %c0_35] : memref<4x32x8xf32, #tpu.memory_space<vmem>>, vector<1x32x8xf32>
    %52 = vector.shape_cast %51 : vector<1x32x8xf32> to vector<32x8xf32>
    %cst_36 = arith.constant dense<0.000000e+00> : vector<8x8xf32>
    %53 = tpu.matmul %13, %52, %cst_36 {dimension_numbers = #tpu.dot_dimension_numbers<[1], [0], [0], [1], [0, 0, 1, 1], [], []>} : vector<8x32xf32>, vector<32x8xf32>, vector<8x8xf32> -> vector<8x8xf32>
    %c1_37 = arith.constant 1 : index
    %c0_38 = arith.constant 0 : index
    %c0_39 = arith.constant 0 : index
    %54 = vector.load %arg6[%c1_37, %c0_38, %c0_39] : memref<4x32x8xf32, #tpu.memory_space<vmem>>, vector<1x32x8xf32>
    %55 = vector.shape_cast %54 : vector<1x32x8xf32> to vector<32x8xf32>
    %cst_40 = arith.constant dense<0.000000e+00> : vector<8x8xf32>
    %56 = tpu.matmul %13, %55, %cst_40 {dimension_numbers = #tpu.dot_dimension_numbers<[1], [0], [0], [1], [0, 0, 1, 1], [], []>} : vector<8x32xf32>, vector<32x8xf32>, vector<8x8xf32> -> vector<8x8xf32>
    %c1_41 = arith.constant 1 : index
    %c0_42 = arith.constant 0 : index
    %c0_43 = arith.constant 0 : index
    %57 = vector.load %arg7[%c1_41, %c0_42, %c0_43] : memref<4x32x8xf32, #tpu.memory_space<vmem>>, vector<1x32x8xf32>
    %58 = vector.shape_cast %57 : vector<1x32x8xf32> to vector<32x8xf32>
    %cst_44 = arith.constant dense<0.000000e+00> : vector<8x8xf32>
    %59 = tpu.matmul %13, %58, %cst_44 {dimension_numbers = #tpu.dot_dimension_numbers<[1], [0], [0], [1], [0, 0, 1, 1], [], []>} : vector<8x32xf32>, vector<32x8xf32>, vector<8x8xf32> -> vector<8x8xf32>
    %cst_45 = arith.constant dense<0.000000e+00> : vector<8x8xf32>
    %60 = tpu.matmul %53, %56, %cst_45 {dimension_numbers = #tpu.dot_dimension_numbers<[1], [1], [0], [0], [0, 0, 1, 0], [], []>} : vector<8x8xf32>, vector<8x8xf32>, vector<8x8xf32> -> vector<8x8xf32>
    %c1_46 = arith.constant 1 : index
    %c0_47 = arith.constant 0 : index
    %c0_48 = arith.constant 0 : index
    %61 = vector.load %arg2[%c1_46, %c0_47, %c0_48] : memref<4x8x8xf32, #tpu.memory_space<vmem>>, vector<1x8x8xf32>
    %62 = vector.shape_cast %61 : vector<1x8x8xf32> to vector<8x8xf32>
    %63 = arith.addf %60, %62 : vector<8x8xf32>
    %64 = vector.broadcast %19 : vector<1x8xf32> to vector<8x8xf32>
    %65 = arith.addf %63, %64 : vector<8x8xf32>
    %cst_49 = arith.constant dense<0xFF800000> : vector<8xf32>
    %66 = vector.multi_reduction <maximumf>, %65, %cst_49 [1] : vector<8x8xf32> to vector<8xf32>
    %67 = vector.shape_cast %66 : vector<8xf32> to vector<8x1xf32>
    %68 = vector.broadcast %67 : vector<8x1xf32> to vector<8x8xf32>
    %69 = arith.subf %65, %68 : vector<8x8xf32>
    %70 = math.exp %69 : vector<8x8xf32>
    %cst_50 = arith.constant dense<0.000000e+00> : vector<8xf32>
    %71 = vector.multi_reduction <add>, %70, %cst_50 [1] : vector<8x8xf32> to vector<8xf32>
    %72 = vector.shape_cast %71 : vector<8xf32> to vector<8x1xf32>
    %73 = tpu.reciprocal %72 {approx = true} : vector<8x1xf32> -> vector<8x1xf32>
    %74 = vector.broadcast %73 : vector<8x1xf32> to vector<8x8xf32>
    %75 = arith.mulf %70, %74 : vector<8x8xf32>
    %cst_51 = arith.constant dense<0.000000e+00> : vector<8x8xf32>
    %76 = tpu.matmul %75, %59, %cst_51 {dimension_numbers = #tpu.dot_dimension_numbers<[1], [0], [0], [1], [0, 0, 1, 1], [], []>} : vector<8x8xf32>, vector<8x8xf32>, vector<8x8xf32> -> vector<8x8xf32>
    %c1_52 = arith.constant 1 : index
    %c0_53 = arith.constant 0 : index
    %c0_54 = arith.constant 0 : index
    %77 = vector.load %arg8[%c1_52, %c0_53, %c0_54] : memref<4x8x32xf32, #tpu.memory_space<vmem>>, vector<1x8x32xf32>
    %78 = vector.shape_cast %77 : vector<1x8x32xf32> to vector<8x32xf32>
    %cst_55 = arith.constant dense<0.000000e+00> : vector<8x32xf32>
    %79 = tpu.matmul %76, %78, %cst_55 {dimension_numbers = #tpu.dot_dimension_numbers<[1], [0], [0], [1], [0, 0, 1, 1], [], []>} : vector<8x8xf32>, vector<8x32xf32>, vector<8x32xf32> -> vector<8x32xf32>
    %80 = arith.addf %50, %79 : vector<8x32xf32>
    %c2 = arith.constant 2 : index
    %c0_56 = arith.constant 0 : index
    %c0_57 = arith.constant 0 : index
    %81 = vector.load %arg5[%c2, %c0_56, %c0_57] : memref<4x32x8xf32, #tpu.memory_space<vmem>>, vector<1x32x8xf32>
    %82 = vector.shape_cast %81 : vector<1x32x8xf32> to vector<32x8xf32>
    %cst_58 = arith.constant dense<0.000000e+00> : vector<8x8xf32>
    %83 = tpu.matmul %13, %82, %cst_58 {dimension_numbers = #tpu.dot_dimension_numbers<[1], [0], [0], [1], [0, 0, 1, 1], [], []>} : vector<8x32xf32>, vector<32x8xf32>, vector<8x8xf32> -> vector<8x8xf32>
    %c2_59 = arith.constant 2 : index
    %c0_60 = arith.constant 0 : index
    %c0_61 = arith.constant 0 : index
    %84 = vector.load %arg6[%c2_59, %c0_60, %c0_61] : memref<4x32x8xf32, #tpu.memory_space<vmem>>, vector<1x32x8xf32>
    %85 = vector.shape_cast %84 : vector<1x32x8xf32> to vector<32x8xf32>
    %cst_62 = arith.constant dense<0.000000e+00> : vector<8x8xf32>
    %86 = tpu.matmul %13, %85, %cst_62 {dimension_numbers = #tpu.dot_dimension_numbers<[1], [0], [0], [1], [0, 0, 1, 1], [], []>} : vector<8x32xf32>, vector<32x8xf32>, vector<8x8xf32> -> vector<8x8xf32>
    %c2_63 = arith.constant 2 : index
    %c0_64 = arith.constant 0 : index
    %c0_65 = arith.constant 0 : index
    %87 = vector.load %arg7[%c2_63, %c0_64, %c0_65] : memref<4x32x8xf32, #tpu.memory_space<vmem>>, vector<1x32x8xf32>
    %88 = vector.shape_cast %87 : vector<1x32x8xf32> to vector<32x8xf32>
    %cst_66 = arith.constant dense<0.000000e+00> : vector<8x8xf32>
    %89 = tpu.matmul %13, %88, %cst_66 {dimension_numbers = #tpu.dot_dimension_numbers<[1], [0], [0], [1], [0, 0, 1, 1], [], []>} : vector<8x32xf32>, vector<32x8xf32>, vector<8x8xf32> -> vector<8x8xf32>
    %cst_67 = arith.constant dense<0.000000e+00> : vector<8x8xf32>
    %90 = tpu.matmul %83, %86, %cst_67 {dimension_numbers = #tpu.dot_dimension_numbers<[1], [1], [0], [0], [0, 0, 1, 0], [], []>} : vector<8x8xf32>, vector<8x8xf32>, vector<8x8xf32> -> vector<8x8xf32>
    %c2_68 = arith.constant 2 : index
    %c0_69 = arith.constant 0 : index
    %c0_70 = arith.constant 0 : index
    %91 = vector.load %arg2[%c2_68, %c0_69, %c0_70] : memref<4x8x8xf32, #tpu.memory_space<vmem>>, vector<1x8x8xf32>
    %92 = vector.shape_cast %91 : vector<1x8x8xf32> to vector<8x8xf32>
    %93 = arith.addf %90, %92 : vector<8x8xf32>
    %94 = vector.broadcast %19 : vector<1x8xf32> to vector<8x8xf32>
    %95 = arith.addf %93, %94 : vector<8x8xf32>
    %cst_71 = arith.constant dense<0xFF800000> : vector<8xf32>
    %96 = vector.multi_reduction <maximumf>, %95, %cst_71 [1] : vector<8x8xf32> to vector<8xf32>
    %97 = vector.shape_cast %96 : vector<8xf32> to vector<8x1xf32>
    %98 = vector.broadcast %97 : vector<8x1xf32> to vector<8x8xf32>
    %99 = arith.subf %95, %98 : vector<8x8xf32>
    %100 = math.exp %99 : vector<8x8xf32>
    %cst_72 = arith.constant dense<0.000000e+00> : vector<8xf32>
    %101 = vector.multi_reduction <add>, %100, %cst_72 [1] : vector<8x8xf32> to vector<8xf32>
    %102 = vector.shape_cast %101 : vector<8xf32> to vector<8x1xf32>
    %103 = tpu.reciprocal %102 {approx = true} : vector<8x1xf32> -> vector<8x1xf32>
    %104 = vector.broadcast %103 : vector<8x1xf32> to vector<8x8xf32>
    %105 = arith.mulf %100, %104 : vector<8x8xf32>
    %cst_73 = arith.constant dense<0.000000e+00> : vector<8x8xf32>
    %106 = tpu.matmul %105, %89, %cst_73 {dimension_numbers = #tpu.dot_dimension_numbers<[1], [0], [0], [1], [0, 0, 1, 1], [], []>} : vector<8x8xf32>, vector<8x8xf32>, vector<8x8xf32> -> vector<8x8xf32>
    %c2_74 = arith.constant 2 : index
    %c0_75 = arith.constant 0 : index
    %c0_76 = arith.constant 0 : index
    %107 = vector.load %arg8[%c2_74, %c0_75, %c0_76] : memref<4x8x32xf32, #tpu.memory_space<vmem>>, vector<1x8x32xf32>
    %108 = vector.shape_cast %107 : vector<1x8x32xf32> to vector<8x32xf32>
    %cst_77 = arith.constant dense<0.000000e+00> : vector<8x32xf32>
    %109 = tpu.matmul %106, %108, %cst_77 {dimension_numbers = #tpu.dot_dimension_numbers<[1], [0], [0], [1], [0, 0, 1, 1], [], []>} : vector<8x8xf32>, vector<8x32xf32>, vector<8x32xf32> -> vector<8x32xf32>
    %110 = arith.addf %80, %109 : vector<8x32xf32>
    %c3 = arith.constant 3 : index
    %c0_78 = arith.constant 0 : index
    %c0_79 = arith.constant 0 : index
    %111 = vector.load %arg5[%c3, %c0_78, %c0_79] : memref<4x32x8xf32, #tpu.memory_space<vmem>>, vector<1x32x8xf32>
    %112 = vector.shape_cast %111 : vector<1x32x8xf32> to vector<32x8xf32>
    %cst_80 = arith.constant dense<0.000000e+00> : vector<8x8xf32>
    %113 = tpu.matmul %13, %112, %cst_80 {dimension_numbers = #tpu.dot_dimension_numbers<[1], [0], [0], [1], [0, 0, 1, 1], [], []>} : vector<8x32xf32>, vector<32x8xf32>, vector<8x8xf32> -> vector<8x8xf32>
    %c3_81 = arith.constant 3 : index
    %c0_82 = arith.constant 0 : index
    %c0_83 = arith.constant 0 : index
    %114 = vector.load %arg6[%c3_81, %c0_82, %c0_83] : memref<4x32x8xf32, #tpu.memory_space<vmem>>, vector<1x32x8xf32>
    %115 = vector.shape_cast %114 : vector<1x32x8xf32> to vector<32x8xf32>
    %cst_84 = arith.constant dense<0.000000e+00> : vector<8x8xf32>
    %116 = tpu.matmul %13, %115, %cst_84 {dimension_numbers = #tpu.dot_dimension_numbers<[1], [0], [0], [1], [0, 0, 1, 1], [], []>} : vector<8x32xf32>, vector<32x8xf32>, vector<8x8xf32> -> vector<8x8xf32>
    %c3_85 = arith.constant 3 : index
    %c0_86 = arith.constant 0 : index
    %c0_87 = arith.constant 0 : index
    %117 = vector.load %arg7[%c3_85, %c0_86, %c0_87] : memref<4x32x8xf32, #tpu.memory_space<vmem>>, vector<1x32x8xf32>
    %118 = vector.shape_cast %117 : vector<1x32x8xf32> to vector<32x8xf32>
    %cst_88 = arith.constant dense<0.000000e+00> : vector<8x8xf32>
    %119 = tpu.matmul %13, %118, %cst_88 {dimension_numbers = #tpu.dot_dimension_numbers<[1], [0], [0], [1], [0, 0, 1, 1], [], []>} : vector<8x32xf32>, vector<32x8xf32>, vector<8x8xf32> -> vector<8x8xf32>
    %cst_89 = arith.constant dense<0.000000e+00> : vector<8x8xf32>
    %120 = tpu.matmul %113, %116, %cst_89 {dimension_numbers = #tpu.dot_dimension_numbers<[1], [1], [0], [0], [0, 0, 1, 0], [], []>} : vector<8x8xf32>, vector<8x8xf32>, vector<8x8xf32> -> vector<8x8xf32>
    %c3_90 = arith.constant 3 : index
    %c0_91 = arith.constant 0 : index
    %c0_92 = arith.constant 0 : index
    %121 = vector.load %arg2[%c3_90, %c0_91, %c0_92] : memref<4x8x8xf32, #tpu.memory_space<vmem>>, vector<1x8x8xf32>
    %122 = vector.shape_cast %121 : vector<1x8x8xf32> to vector<8x8xf32>
    %123 = arith.addf %120, %122 : vector<8x8xf32>
    %124 = vector.broadcast %19 : vector<1x8xf32> to vector<8x8xf32>
    %125 = arith.addf %123, %124 : vector<8x8xf32>
    %cst_93 = arith.constant dense<0xFF800000> : vector<8xf32>
    %126 = vector.multi_reduction <maximumf>, %125, %cst_93 [1] : vector<8x8xf32> to vector<8xf32>
    %127 = vector.shape_cast %126 : vector<8xf32> to vector<8x1xf32>
    %128 = vector.broadcast %127 : vector<8x1xf32> to vector<8x8xf32>
    %129 = arith.subf %125, %128 : vector<8x8xf32>
    %130 = math.exp %129 : vector<8x8xf32>
    %cst_94 = arith.constant dense<0.000000e+00> : vector<8xf32>
    %131 = vector.multi_reduction <add>, %130, %cst_94 [1] : vector<8x8xf32> to vector<8xf32>
    %132 = vector.shape_cast %131 : vector<8xf32> to vector<8x1xf32>
    %133 = tpu.reciprocal %132 {approx = true} : vector<8x1xf32> -> vector<8x1xf32>
    %134 = vector.broadcast %133 : vector<8x1xf32> to vector<8x8xf32>
    %135 = arith.mulf %130, %134 : vector<8x8xf32>
    %cst_95 = arith.constant dense<0.000000e+00> : vector<8x8xf32>
    %136 = tpu.matmul %135, %119, %cst_95 {dimension_numbers = #tpu.dot_dimension_numbers<[1], [0], [0], [1], [0, 0, 1, 1], [], []>} : vector<8x8xf32>, vector<8x8xf32>, vector<8x8xf32> -> vector<8x8xf32>
    %c3_96 = arith.constant 3 : index
    %c0_97 = arith.constant 0 : index
    %c0_98 = arith.constant 0 : index
    %137 = vector.load %arg8[%c3_96, %c0_97, %c0_98] : memref<4x8x32xf32, #tpu.memory_space<vmem>>, vector<1x8x32xf32>
    %138 = vector.shape_cast %137 : vector<1x8x32xf32> to vector<8x32xf32>
    %cst_99 = arith.constant dense<0.000000e+00> : vector<8x32xf32>
    %139 = tpu.matmul %136, %138, %cst_99 {dimension_numbers = #tpu.dot_dimension_numbers<[1], [0], [0], [1], [0, 0, 1, 1], [], []>} : vector<8x8xf32>, vector<8x32xf32>, vector<8x32xf32> -> vector<8x32xf32>
    %140 = arith.addf %110, %139 : vector<8x32xf32>
    %c0_100 = arith.constant 0 : index
    %c0_101 = arith.constant 0 : index
    %141 = vector.load %arg9[%c0_100, %c0_101] : memref<8x32xf32, #tpu.memory_space<vmem>>, vector<8x32xf32>
    tpu.vector_store %arg9[%c0_100, %c0_101], %140 {strides = array<i32>} : memref<8x32xf32, #tpu.memory_space<vmem>>, vector<8x32xf32>,
    return
  }
  func.func @transform_0(%arg0: i32) -> (i32, i32) {
    %c0_i32 = arith.constant 0 : i32
    %c0_i32_0 = arith.constant 0 : i32
    return %arg0, %c0_i32 : i32, i32
  }
  func.func @transform_1(%arg0: i32) -> (i32, i32, i32) {
    %c0_i32 = arith.constant 0 : i32
    %c0_i32_0 = arith.constant 0 : i32
    %c0_i32_1 = arith.constant 0 : i32
    %c0_i32_2 = arith.constant 0 : i32
    return %c0_i32, %c0_i32_0, %c0_i32_1 : i32, i32, i32
  }
  func.func @transform_2(%arg0: i32) -> (i32, i32, i32) {
    %c0_i32 = arith.constant 0 : i32
    %c0_i32_0 = arith.constant 0 : i32
    %c0_i32_1 = arith.constant 0 : i32
    return %arg0, %c0_i32, %c0_i32_0 : i32, i32, i32
  }
  func.func @transform_3(%arg0: i32) -> (i32, i32) {
    %c0_i32 = arith.constant 0 : i32
    %c0_i32_0 = arith.constant 0 : i32
    %c0_i32_1 = arith.constant 0 : i32
    return %c0_i32, %c0_i32_0 : i32, i32
  }
  func.func @transform_4(%arg0: i32) -> (i32, i32, i32) {
    %c0_i32 = arith.constant 0 : i32
    %c0_i32_0 = arith.constant 0 : i32
    %c0_i32_1 = arith.constant 0 : i32
    %c0_i32_2 = arith.constant 0 : i32
    return %c0_i32, %c0_i32_0, %c0_i32_1 : i32, i32, i32
  }
  func.func @transform_5(%arg0: i32) -> (i32, i32, i32) {
    %c0_i32 = arith.constant 0 : i32
    %c0_i32_0 = arith.constant 0 : i32
    %c0_i32_1 = arith.constant 0 : i32
    %c0_i32_2 = arith.constant 0 : i32
    return %c0_i32, %c0_i32_0, %c0_i32_1 : i32, i32, i32
  }
  func.func @transform_6(%arg0: i32) -> (i32, i32, i32) {
    %c0_i32 = arith.constant 0 : i32
    %c0_i32_0 = arith.constant 0 : i32
    %c0_i32_1 = arith.constant 0 : i32
    %c0_i32_2 = arith.constant 0 : i32
    return %c0_i32, %c0_i32_0, %c0_i32_1 : i32, i32, i32
  }
  func.func @transform_7(%arg0: i32) -> (i32, i32, i32) {
    %c0_i32 = arith.constant 0 : i32
    %c0_i32_0 = arith.constant 0 : i32
    %c0_i32_1 = arith.constant 0 : i32
    %c0_i32_2 = arith.constant 0 : i32
    return %c0_i32, %c0_i32_0, %c0_i32_1 : i32, i32, i32
  }
  func.func @transform_8(%arg0: i32) -> (i32, i32) {
    %c0_i32 = arith.constant 0 : i32
    %c0_i32_0 = arith.constant 0 : i32
    return %arg0, %c0_i32 : i32, i32
  }
}

</mosaic_0001>

<bundles_post_ra>
// kernel: tpu_custom_call.1
= control target key start
LH: loop header
LB: loop body
LE: loop exit
PB: predicated region body
PF: predicated region fallthrough
CT: control target
= control target key end

     0   :  { %13 = vsyncpa [#allocation3], 0  ;;  %s3248_s0 = inlined_call_operand.vmem [shape: f32[16,32], index: 0, kind: input, shape index: {}]   ;;  %s3249_s1 = inlined_call_operand.vmem [shape: f32[4,8,8], index: 1, kind: input, shape index: {}]   ;;  %s3250_s2 = inlined_call_operand.vmem [shape: f32[2,1,8], index: 2, kind: input, shape index: {}]   ;;  %s3251_s3 = inlined_call_operand.vmem [shape: f32[1,32], index: 3, kind: input, shape index: {}]   ;;  %s3252_s4 = inlined_call_operand.vmem [shape: f32[4,32,8], index: 4, kind: input, shape index: {}]   ;;  %s3253_s5 = inlined_call_operand.vmem [shape: f32[4,32,8], index: 5, kind: input, shape index: {}]   ;;  %s3254_s6 = inlined_call_operand.vmem [shape: f32[4,32,8], index: 6, kind: input, shape index: {}]   ;;  %s3255_s7 = inlined_call_operand.vmem [shape: f32[4,8,32], index: 7, kind: input, shape index: {}]   ;;  %s3256_s8 = inlined_call_operand.hbm [shape: f32[16,32], index: 8, kind: output, shape index: {}]  }
   0x1   :  { %15 = vsyncpa [#allocation3 + $0x1], 0  ;;  %s2805_s27 = smov 0   ;;  %s2807_s28 = smov 0  }
   0x2   :  { %s2809_s29 = smov 0   ;;  %s2811_s30 = smov 0  }
   0x3 LB: > { %s2826_s9 = sadd.s32 4294967295, %s2755_s30   ;;  %s2279_s10 = sadd.s32 4294967294, %s2755_s30   ;;  %s2755_s30 = sphi %s2811_s30, %s3262_s30   ;;  %s2751_s29 = sphi %s2809_s29, %s3261_s29   ;;  %s2747_s28 = sphi %s2807_s28, %s3260_s28   ;;  %s2743_s27 = sphi %s2805_s27, %s3259_s27  }
   0x4   : > { %s2830_s11 = sadd.s32 1, %s2755_s30   ;;  %s206_s12 = sadd.s32 1, %s2751_s29 }
   0x5   : > { %s203_s13 = ssub.s32 %s2755_s30, %s2830_s11  ;;  %p216_p0 = scmp.ne.s32.totalorder %s2751_s29, %s2747_s28 }
   0x6   : > { %p204_p1 = scmp.eq.s32.totalorder %s203_s13, 0  ;;  %p217_p2 = scmp.eq.s32.totalorder %s2826_s9, 1 }
   0x7   : > { %p222_p3 = scmp.ne.s32.totalorder %s2747_s28, %s2743_s27  ;;  %p223_p4 = scmp.eq.s32.totalorder %s2279_s10, 1 }
   0x8   : > { %s2841_s14 = scalar_select %p204_p1, %s2751_s29, %s206_s12  }
   0x9   : > { %p2843_p5 = por %p217_p2, %p216_p0  ;;  %p2847_p6 = por %p223_p4, %p222_p3 }
   0xa   : > { %p2282_p7 = scmp.ge.s32.totalorder %s2755_s30, 1  ;;  %p272_p8 = scmp.lt.s32.totalorder %s2755_s30, 3 }
   0xc   : > { %p273_p9 = pnand %p2282_p7, %p272_p8 }
   0xd   : > { %p308_p10 = scmp.lt.s32.totalorder (!%p273_p9), %s2826_s9, 1  ;;  %s305_s25 = sand.u32 (!%p273_p9), 1, %s2747_s28  }
   0xe   : > { %276 = sbr.rel (%p273_p9) target bundleno = 3815 (0xee7), region = 52  ;;  %s2283_s26 = sshll.u32 (!%p273_p9), %s305_s25, 3 }
   0xf   : > { %s2357_s10 = sshll.u32 (!%p273_p9), %s2826_s9, 7  ;;  %s307_s12 = scalar_lea.vmem (!%p273_p9), [#allocation2], %s2283_s26 }
  0x10   : > { %s2211_s13 = sshll.u32 (!%p273_p9), %s307_s12, 4  ;;  %s3212_s20 = scalar_lea.hbm (!%p273_p9), %s3256_s8, %s2357_s10  ;;  %s2212_s13 = int_to_ptr.vmem [resolvable:$true] %s2211_s13 }
  0x13   : > { %s2855_s17 = scalar_select %p308_p10, %s2826_s9, 1  ;;  %vm317_vm0 = vcmask 261120   ;;  %v2757_v3 = vmov 0.0   ;;  %v340_v4 = vld [vmem:[%s3252_s4 + $0x18] sm:$0xff]  ;;  %v339_v6 = vld [vmem:[%s3252_s4 + $0x10] sm:$0xff]  ;;  %v338_v8 = vld [vmem:[%s3252_s4 + $0x8] sm:$0xff]  ;;  %v641_v41 = vlaneseq }
  0x14   : > { %2444 = vmatprep.subr.mxu0 %v2757_v3  ;;  %2455 = vmatprep.subr.mxu1 %v2757_v3  ;;  %v417_v5 = vld [vmem:[%s3253_s5 + $0x18] sm:$0xff]  ;;  %v416_v7 = vld [vmem:[%s3253_s5 + $0x10] sm:$0xff]  ;;  %v415_v9 = vld [vmem:[%s3253_s5 + $0x8] sm:$0xff]  ;;  %vm2758_vm1 = vmmov 0   ;;  %vm563_vm2 = vcmask 64512   ;;  %s2759_s9 = smov [#allocation2]  }
  0x15   : > { %s2284_s18 = sshll.u32 %s2855_s17, 3  ;;  %2445 = vmatpush3.msra.mxu0 %v340_v4  ;;  %2456 = vmatpush3.msra.mxu1 %v417_v5  ;;  %v337_v10 = vld [vmem:[%s3252_s4] sm:$0xff]  ;;  %v491_v19 = vld [vmem:[%s3254_s6 + $0x18] sm:$0xff]  ;;  %v490_v20 = vld [vmem:[%s3254_s6 + $0x10] sm:$0xff]  ;;  %v642_v44 = vshrl.u32 %v641_v41, 7  ;;  %s2699_s22 = sshll.u32 %s2759_s9, 4  ;;  %s2700_s22 = int_to_ptr.vmem [resolvable:$false] %s2699_s22 }
  0x16   : > { %s311_s21 = scalar_lea.vmem %s3248_s0, %s2284_s18  ;;  %2446 = vmatprep.subr.mxu0 %v2757_v3  ;;  %2457 = vmatprep.subr.mxu1 %v2757_v3  ;;  %v414_v11 = vld [vmem:[%s3253_s5] sm:$0xff]  ;;  %v489_v21 = vld [vmem:[%s3254_s6 + $0x8] sm:$0xff]  ;;  %v2295_v23 = vld [vmem:[%s3252_s4 + $0x38] sm:$0xff]  ;;  %s314_s18 = scalar_lea.vmem %s3250_s2, %s2855_s17 }
  0x17   : > { %v315_v0 = vld [vmem:[%s311_s21] sm:$0xff]  ;;  %2447 = vmatpush3.msra.mxu0 %v339_v6  ;;  %2458 = vmatpush3.msra.mxu1 %v416_v7  ;;  %v2294_v24 = vld [vmem:[%s3252_s4 + $0x30] sm:$0xff]  ;;  %v2293_v25 = vld [vmem:[%s3252_s4 + $0x28] sm:$0xff]  ;;  %v643_v46 = vsub.s32 0, %v642_v44  ;;  %s2198_s17 = scalar_lea.sflag [#allocation3], %s305_s25  ;;  %s2695_s21 = scalar_lea.vmem %s2212_s13, 128 }
  0x18   : > { %v316_v1 = vmul.f32 %v315_v0, %v315_v0  ;;  %2448 = vmatprep.subr.mxu0 %v2757_v3  ;;  %2459 = vmatprep.subr.mxu1 %v2757_v3  ;;  %v2285_v16 = vld [vmem:[%s3251_s3] ss:$0 sm:$0xff]  ;;  %v2305_v27 = vld [vmem:[%s3254_s6 + $0x38] sm:$0xff]  ;;  %v2304_v28 = vld [vmem:[%s3254_s6 + $0x30] sm:$0xff]  ;;  %p2696_p11 = scmp.ne.s32.totalorder %s2212_s13, %s2695_s21  ;;  %s2701_s23 = scalar_lea.vmem %s2700_s22, 256 }
  0x19   : > { %2449 = vmatpush3.msra.mxu0 %v338_v8  ;;  %2460 = vmatpush3.msra.mxu1 %v415_v9  ;;  %v488_v22 = vld [vmem:[%s3254_s6] sm:$0xff]  ;;  %v2303_v29 = vld [vmem:[%s3254_s6 + $0x28] sm:$0xff]  ;;  %v2300_v62 = vld [vmem:[%s3253_s5 + $0x38] sm:$0xff]  ;;  %p2702_p0 = scmp.lt.s32.totalorder %s2212_s13, %s2700_s22  ;;  %p2703_p1 = scmp.lt.s32.totalorder %s2701_s23, %s2695_s21 }
  0x1a   : > { %v318_v2 = vsel %vm317_vm0, %v316_v1, 0.0  ;;  %2450 = vmatprep.subr.mxu0 %v2757_v3  ;;  %2461 = vmatprep.subr.mxu1 %v2757_v3  ;;  %v2292_v26 = vld [vmem:[%s3252_s4 + $0x20] sm:$0xff]  ;;  %v2299_v63 = vld [vmem:[%s3253_s5 + $0x30] sm:$0xff]  ;;  %v2307_v7 = vld [vmem:[%s3249_s1 + $0x8] sm:$0xff]  ;;  %p2697_p12 = pnand %p2696_p11, %p2843_p5 }
  0x1b   : > { %319 = vadd.xlane.f32.xlu0 %v318_v2  ;;  %2451 = vmatpush3.msra.mxu0 %v337_v10  ;;  %v2302_v30 = vld [vmem:[%s3254_s6 + $0x20] sm:$0xff]  ;;  %p2704_p2 = por %p2703_p1, %p2702_p0 }
  0x1c   : > { %2452 = vmatprep.mubr.msk.f32.mxu0 %vm2758_vm1, %v2757_v3  ;;  %2462 = vmatpush3.msra.mxu1 %v414_v11  ;;  %v334_v42 = vld [vmem:[%s314_s18] sm:$0x1]  ;;  %p2698_p13 = pneg %p2697_p12 }
  0x1d   : > { %2463 = vmatprep.mubr.msk.f32.mxu1 %vm2758_vm1, %v2757_v3  ;;  %2466 = vmatprep.subr.mxu0 %v2757_v3  ;;  %v335_v43 = vsub.f32 1.0, %v334_v42  ;;  %v562_v47 = vld [vmem:[%s3249_s1] sm:$0xff] }
  0x1e   : > { %2477 = vmatprep.subr.mxu1 %v2757_v3  ;;  %v2297_v1 = vld [vmem:[%s3253_s5 + $0x20] sm:$0xff]  ;;  %p2705_p3 = pnand %p2704_p2, %p2698_p13 }
  0x1f   : > { %v336_v45 = vmul.f32 -1000.0, %v335_v43 }
  0x21   : > { %v2986_v48 = vrot.slane %v336_v45, %v643_v46 }
  0xa4   : > { %v320_v12 = vpop.xlane.xlu0 %319 }
  0xa5   : > { %v322_v13 = vmul.f32 0.03125, %v320_v12 }
  0xa7   : > { %v323_v14 = vadd.f32 1e-06, %v322_v13 }
  0xa9   : > { %2677 = vrsqrt.f32 %v323_v14 }
  0xb6   : > { %v2678_v15 = vpop.eup %2677 }
  0xb7   : > { %v325_v17 = vmul.f32 %v2678_v15, %v315_v0  ;;  %v2298_v0 = vld [vmem:[%s3253_s5 + $0x28] sm:$0xff] }
  0xb9   : > { %v2903_v18 = vmul.f32 %v2285_v16, %v325_v17 }
  0xbb   : > { %2453 = vmatmul.mubr.msk.f32.vlgmr.msra.gmra.mxu0 %vm317_vm0, %v2903_v18  ;;  %2464 = vmatmul.mubr.msk.f32.vlgmr.msra.gmra.mxu1 %vm317_vm0, %v2903_v18 }
  0xbc   : > { %2467 = vmatpush3.msra.mxu0 %v491_v19  ;;  %2474 = vmatprep.mubr.msk.f32.mxu0 %vm2758_vm1, %v2757_v3  ;;  %v2311_v19 = vld [vmem:[%s3255_s7 + $0x8] sm:$0xff] }
  0xbd   : > { %2468 = vmatprep.subr.mxu0 %v2757_v3  ;;  %2479 = vmatprep.mubr.msk.f32.mxu1 %vm2758_vm1, %v2757_v3 }
  0xbe   : > { %2469 = vmatpush3.msra.mxu0 %v490_v20 }
  0xbf   : > { %2470 = vmatprep.subr.mxu0 %v2757_v3 }
  0xc0   : > { %2471 = vmatpush3.msra.mxu0 %v489_v21 }
  0xc1   : > { %2472 = vmatprep.subr.mxu0 %v2757_v3 }
  0xc2   : > { %2473 = vmatpush3.msra.mxu0 %v488_v22 }
  0xc3   : > { %2475 = vmatmul.mubr.msk.f32.vlgmr.msra.gmra.mxu0 %vm317_vm0, %v2903_v18  ;;  %2487 = vmatprep.subr.mxu0 %v2757_v3 }
  0xc4   : > { %2488 = vmatpush3.msra.mxu0 %v2295_v23  ;;  %2495 = vmatprep.mubr.msk.f32.mxu0 %vm2758_vm1, %v2757_v3  ;;  %v731_v23 = vld [vmem:[%s3255_s7] sm:$0xff] }
  0xc5   : > { %2489 = vmatprep.subr.mxu0 %v2757_v3 }
  0xc6   : > { %2490 = vmatpush3.msra.mxu0 %v2294_v24  ;;  %v2322_v24 = vld [vmem:[%s3253_s5 + $0x58] sm:$0xff] }
  0xc7   : > { %2491 = vmatprep.subr.mxu0 %v2757_v3 }
  0xc8   : > { %2492 = vmatpush3.msra.mxu0 %v2293_v25  ;;  %v2321_v25 = vld [vmem:[%s3253_s5 + $0x50] sm:$0xff] }
  0xc9   : > { %2493 = vmatprep.subr.mxu0 %v2757_v3 }
  0xca   : > { %2494 = vmatpush3.msra.mxu0 %v2292_v26  ;;  %v2320_v26 = vld [vmem:[%s3253_s5 + $0x48] sm:$0xff] }
  0xcb   : > { %2496 = vmatmul.mubr.msk.f32.vlgmr.msra.gmra.mxu0 %vm317_vm0, %v2903_v18  ;;  %2509 = vmatprep.subr.mxu0 %v2757_v3 }
  0xcc   : > { %2510 = vmatpush3.msra.mxu0 %v2305_v27  ;;  %2517 = vmatprep.mubr.msk.f32.mxu0 %vm2758_vm1, %v2757_v3  ;;  %v2319_v27 = vld [vmem:[%s3253_s5 + $0x40] sm:$0xff] }
  0xcd   : > { %2511 = vmatprep.subr.mxu0 %v2757_v3 }
  0xce   : > { %2512 = vmatpush3.msra.mxu0 %v2304_v28  ;;  %v2317_v28 = vld [vmem:[%s3252_s4 + $0x58] sm:$0xff] }
  0xcf   : > { %2513 = vmatprep.subr.mxu0 %v2757_v3 }
  0xd0   : > { %2514 = vmatpush3.msra.mxu0 %v2303_v29 }
  0xd1   : > { %2515 = vmatprep.subr.mxu0 %v2757_v3 }
  0xd2   : > { %2516 = vmatpush3.msra.mxu0 %v2302_v30  ;;  %v2316_v30 = vld [vmem:[%s3252_s4 + $0x50] sm:$0xff] }
  0xd3   : > { %2518 = vmatmul.mubr.msk.f32.vlgmr.msra.gmra.mxu0 %vm317_vm0, %v2903_v18  ;;  %2530 = vmatprep.subr.mxu0 %v2757_v3 }
  0xd4   : > { %2532 = vmatprep.mubr.msk.f32.mxu0 %vm2758_vm1, %v2757_v3  ;;  %2531 = vmatpush3.msra.mxu0 %v2311_v19 }
  0xd5   : > { %2540 = vmatprep.subr.mxu0 %v2757_v3 }
 0x17b   : > { %v410_v31 = vpop.f32.mrf.mxu0  ;;  %v484_v32 = vpop.f32.mrf.mxu1 }
 0x17c   : > { %2478 = vmatpush3.xpose.msk.msra.mxu1 %vm563_vm2, %v484_v32  ;;  %v2315_v32 = vld [vmem:[%s3252_s4 + $0x48] sm:$0xff] }
 0x17d   : > { %v2454_v33 = vpop.f32.mrf.mxu0  ;;  %v2465_v34 = vpop.f32.mrf.mxu1  ;;  %2482 = vmatprep.subr.mxu1 %v2757_v3 }
 0x17e   : > { %v2314_v34 = vld [vmem:[%s3252_s4 + $0x40] sm:$0xff] }
 0x17f   : > { %2480 = vmatmul.mubr.msk.f32.vlgmr.msra.gmra.mxu1 %vm563_vm2, %v410_v31 }
 0x180   : > { %2484 = vmatprep.mubr.msk.f32.mxu1 %vm2758_vm1, %v2757_v3 }
 0x183   : > { %v558_v35 = vpop.f32.mrf.mxu0 }
 0x184   : > { %2483 = vmatpush3.msra.mxu1 %v558_v35 }
 0x185   : > { %v2476_v36 = vpop.f32.mrf.mxu0  ;;  %2498 = vmatprep.subr.mxu1 %v2757_v3 }
 0x186   : > { %v2327_v36 = vld [vmem:[%s3254_s6 + $0x58] sm:$0xff] }
 0x18b   : > { %v803_v37 = vpop.f32.mrf.mxu0 }
 0x18d   : > { %v2497_v38 = vpop.f32.mrf.mxu0 }
 0x18e   : > { %v2325_v38 = vld [vmem:[%s3254_s6 + $0x48] sm:$0xff] }
 0x193   : > { %v953_v39 = vpop.f32.mrf.mxu0 }
 0x195   : > { %v2519_v40 = vpop.f32.mrf.mxu0 }
 0x196   : > { %v2324_v40 = vld [vmem:[%s3254_s6 + $0x40] sm:$0xff] }
 0x23f   : > { %v636_v49 = vpop.f32.mrf.mxu1 }
 0x240   : > { %v637_v50 = vadd.f32 %v636_v49, %v562_v47  ;;  %v2329_v49 = vld [vmem:[%s3249_s1 + $0x10] sm:$0xff] }
 0x241   : > { %v2481_v51 = vpop.f32.mrf.mxu1 }
 0x242   : > { %v646_v52 = vadd.f32 %v2986_v48, %v637_v50 }
 0x244   : > { %v647_v53 = vsel %vm563_vm2, %v646_v52, -inf }
 0x245   : > { %648 = vmax.xlane.f32.xlu0 %v647_v53 }
 0x2ce   : > { %v649_v54 = vpop.xlane.xlu0 %648 }
 0x2cf   : > { %v650_v55 = vsub.f32 %v646_v52, %v649_v54 }
 0x2d1   : > { %v651_v56 = vmul.f32 1.442695, %v650_v55 }
 0x2d3   : > { %2679 = vpow2.f32 %v651_v56 }
 0x2e0   : > { %v2680_v57 = vpop.eup %2679 }
 0x2e1   : > { %v653_v58 = vsel %vm563_vm2, %v2680_v57, 0.0 }
 0x2e2   : > { %654 = vadd.xlane.f32.xlu1 %v653_v58 }
 0x36b   : > { %v655_v59 = vpop.xlane.xlu1 %654 }
 0x36c   : > { %2681 = vrcp.f32 %v655_v59 }
 0x379   : > { %v2682_v60 = vpop.eup %2681 }
 0x37a   : > { %v657_v61 = vmul.f32 %v2682_v60, %v2680_v57  ;;  %v2333_v60 = vld [vmem:[%s3255_s7 + $0x10] sm:$0xff] }
 0x37c   : > { %2485 = vmatmul.mubr.msk.f32.vlgmr.msra.gmra.mxu1 %vm563_vm2, %v657_v61 }
 0x37d   : > { %2499 = vmatpush3.msra.mxu1 %v2300_v62  ;;  %2506 = vmatprep.mubr.msk.f32.mxu1 %vm2758_vm1, %v2757_v3 }
 0x37e   : > { %2500 = vmatprep.subr.mxu1 %v2757_v3 }
 0x37f   : > { %2501 = vmatpush3.msra.mxu1 %v2299_v63 }
 0x380   : > { %2502 = vmatprep.subr.mxu1 %v2757_v3 }
 0x381   : > { %2503 = vmatpush3.msra.mxu1 %v2298_v0  ;;  %v2338_v0 = vld [vmem:[%s3252_s4 + $0x78] sm:$0xff] }
 0x382   : > { %2504 = vmatprep.subr.mxu1 %v2757_v3 }
 0x383   : > { %2505 = vmatpush3.msra.mxu1 %v2297_v1  ;;  %v2337_v1 = vld [vmem:[%s3252_s4 + $0x70] sm:$0xff] }
 0x384   : > { %2507 = vmatmul.mubr.msk.f32.vlgmr.msra.gmra.mxu1 %vm317_vm0, %v2903_v18  ;;  %2520 = vmatprep.subr.mxu1 %v2757_v3 }
 0x385   : > { %2522 = vmatprep.mubr.msk.f32.mxu1 %vm2758_vm1, %v2757_v3 }
 0x43c   : > { %v727_v2 = vpop.f32.mrf.mxu1 }
 0x43e   : > { %v2486_v4 = vpop.f32.mrf.mxu1 }
 0x43f   : > { %v2335_v4 = vld [vmem:[%s3252_s4 + $0x60] sm:$0xff] }
 0x444   : > { %v878_v5 = vpop.f32.mrf.mxu1 }
 0x445   : > { %2521 = vmatpush3.xpose.msk.msra.mxu1 %vm563_vm2, %v878_v5  ;;  %v2348_v5 = vld [vmem:[%s3254_s6 + $0x78] sm:$0xff] }
 0x446   : > { %v2508_v6 = vpop.f32.mrf.mxu1  ;;  %2525 = vmatprep.subr.mxu1 %v2757_v3 }
 0x447   : > { %v2347_v6 = vld [vmem:[%s3254_s6 + $0x70] sm:$0xff] }
 0x448   : > { %2523 = vmatmul.mubr.msk.f32.vlgmr.msra.gmra.mxu1 %vm563_vm2, %v803_v37  ;;  %v2326_v37 = vld [vmem:[%s3254_s6 + $0x50] sm:$0xff] }
 0x449   : > { %2526 = vmatpush3.msra.mxu1 %v953_v39  ;;  %2527 = vmatprep.mubr.msk.f32.mxu1 %vm2758_vm1, %v2757_v3 }
 0x44a   : > { %2535 = vmatprep.subr.mxu1 %v2757_v3 }
 0x508   : > { %v1031_v8 = vpop.f32.mrf.mxu1 }
 0x509   : > { %v1032_v9 = vadd.f32 %v2307_v7, %v1031_v8  ;;  %v2346_v7 = vld [vmem:[%s3254_s6 + $0x68] sm:$0xff]  ;;  %v2345_v8 = vld [vmem:[%s3254_s6 + $0x60] sm:$0xff] }
 0x50a   : > { %v2524_v10 = vpop.f32.mrf.mxu1 }
 0x50b   : > { %v1035_v11 = vadd.f32 %v1032_v9, %v2986_v48  ;;  %v2343_v9 = vld [vmem:[%s3253_s5 + $0x78] sm:$0xff] }
 0x50d   : > { %v1036_v12 = vsel %vm563_vm2, %v1035_v11, -inf }
 0x50e   : > { %1037 = vmax.xlane.f32.xlu1 %v1036_v12 }
 0x597   : > { %v1038_v13 = vpop.xlane.xlu1 %1037 }
 0x598   : > { %v1039_v14 = vsub.f32 %v1035_v11, %v1038_v13  ;;  %v2342_v11 = vld [vmem:[%s3253_s5 + $0x70] sm:$0xff]  ;;  %v2341_v13 = vld [vmem:[%s3253_s5 + $0x68] sm:$0xff] }
 0x59a   : > { %v1040_v15 = vmul.f32 1.442695, %v1039_v14  ;;  %v2340_v14 = vld [vmem:[%s3253_s5 + $0x60] sm:$0xff] }
 0x59c   : > { %2683 = vpow2.f32 %v1040_v15 }
 0x5a9   : > { %v2684_v16 = vpop.eup %2683 }
 0x5aa   : > { %v1042_v17 = vsel %vm563_vm2, %v2684_v16, 0.0 }
 0x5ab   : > { %1043 = vadd.xlane.f32.xlu0 %v1042_v17 }
 0x634   : > { %v1044_v20 = vpop.xlane.xlu0 %1043 }
 0x635   : > { %2685 = vrcp.f32 %v1044_v20 }
 0x642   : > { %v2686_v21 = vpop.eup %2685 }
 0x643   : > { %v1046_v22 = vmul.f32 %v2686_v21, %v2684_v16 }
 0x645   : > { %2528 = vmatmul.mubr.msk.f32.vlgmr.msra.gmra.mxu1 %vm563_vm2, %v1046_v22 }
 0x646   : > { %2536 = vmatpush3.msra.mxu1 %v731_v23  ;;  %2537 = vmatprep.mubr.msk.f32.mxu1 %vm2758_vm1, %v2757_v3 }
 0x647   : > { %2551 = vmatprep.subr.mxu1 %v2757_v3 }
 0x649   : > { %2538 = vmatmul.mubr.msk.f32.vlgmr.msra.gmra.mxu1 %vm563_vm2, %v727_v2  ;;  %v2336_v2 = vld [vmem:[%s3252_s4 + $0x68] sm:$0xff] }
 0x64a   : > { %2552 = vmatpush3.msra.mxu1 %v2322_v24  ;;  %2559 = vmatprep.mubr.msk.f32.mxu1 %vm2758_vm1, %v2757_v3 }
 0x64b   : > { %2553 = vmatprep.subr.mxu1 %v2757_v3 }
 0x64c   : > { %2554 = vmatpush3.msra.mxu1 %v2321_v25 }
 0x64d   : > { %2555 = vmatprep.subr.mxu1 %v2757_v3 }
 0x64e   : > { %2556 = vmatpush3.msra.mxu1 %v2320_v26 }
 0x64f   : > { %2557 = vmatprep.subr.mxu1 %v2757_v3 }
 0x650   : > { %2558 = vmatpush3.msra.mxu1 %v2319_v27 }
 0x651   : > { %2560 = vmatmul.mubr.msk.f32.vlgmr.msra.gmra.mxu1 %vm317_vm0, %v2903_v18  ;;  %2573 = vmatprep.subr.mxu1 %v2757_v3 }
 0x652   : > { %2575 = vmatprep.mubr.msk.f32.mxu1 %vm2758_vm1, %v2757_v3 }
 0x705   : > { %v1116_v29 = vpop.f32.mrf.mxu1 }
 0x706   : > { %2533 = vmatmul.mubr.msk.f32.vlgmr.msra.gmra.mxu0 %vm563_vm2, %v1116_v29 }
 0x707   : > { %2541 = vmatpush3.msra.mxu0 %v2317_v28  ;;  %v2529_v31 = vpop.f32.mrf.mxu1  ;;  %2548 = vmatprep.mubr.msk.f32.mxu0 %vm2758_vm1, %v2757_v3 }
 0x708   : > { %2542 = vmatprep.subr.mxu0 %v2757_v3 }
 0x709   : > { %2543 = vmatpush3.msra.mxu0 %v2316_v30  ;;  %v3073_v33 = vpop.f32.mrf.mxu1 }
 0x70a   : > { %2544 = vmatprep.subr.mxu0 %v2757_v3 }
 0x70b   : > { %2545 = vmatpush3.msra.mxu0 %v2315_v32  ;;  %v2539_v35 = vpop.f32.mrf.mxu1 }
 0x70c   : > { %2546 = vmatprep.subr.mxu0 %v2757_v3  ;;  %v2354_v35 = vld [vmem:[%s3255_s7 + $0x18] sm:$0xff] }
 0x70d   : > { %2547 = vmatpush3.msra.mxu0 %v2314_v34 }
 0x70e   : > { %2549 = vmatmul.mubr.msk.f32.vlgmr.msra.gmra.mxu0 %vm317_vm0, %v2903_v18  ;;  %2562 = vmatprep.subr.mxu0 %v2757_v3 }
 0x70f   : > { %2563 = vmatpush3.msra.mxu0 %v2327_v36  ;;  %2570 = vmatprep.mubr.msk.f32.mxu0 %vm2758_vm1, %v2757_v3 }
 0x710   : > { %2564 = vmatprep.subr.mxu0 %v2757_v3 }
 0x711   : > { %v1414_v39 = vpop.f32.mrf.mxu1  ;;  %2565 = vmatpush3.msra.mxu0 %v2326_v37 }
 0x712   : > { %2566 = vmatprep.subr.mxu0 %v2757_v3  ;;  %2574 = vmatpush3.xpose.msk.msra.mxu1 %vm563_vm2, %v1414_v39 }
 0x713   : > { %v2561_v41 = vpop.f32.mrf.mxu1  ;;  %2567 = vmatpush3.msra.mxu0 %v2325_v38  ;;  %2578 = vmatprep.subr.mxu1 %v2757_v3 }
 0x714   : > { %2568 = vmatprep.subr.mxu0 %v2757_v3 }
 0x715   : > { %2569 = vmatpush3.msra.mxu0 %v2324_v40 }
 0x716   : > { %2571 = vmatmul.mubr.msk.f32.vlgmr.msra.gmra.mxu0 %vm317_vm0, %v2903_v18  ;;  %2583 = vmatprep.subr.mxu0 %v2757_v3 }
 0x717   : > { %2585 = vmatprep.mubr.msk.f32.mxu0 %vm2758_vm1, %v2757_v3  ;;  %2584 = vmatpush3.msra.mxu0 %v2333_v60 }
 0x718   : > { %2599 = vmatprep.subr.mxu0 %v2757_v3 }
 0x7c6   : > { %v3107_v42 = vpop.f32.mrf.mxu0 }
 0x7c7   : > { %v1265_v20 = vadd.f32 %v3073_v33, %v3107_v42 }
 0x7c8   : > { %v2534_v43 = vpop.f32.mrf.mxu0 }
 0x7ce   : > { %v1339_v44 = vpop.f32.mrf.mxu0 }
 0x7cf   : > { %2576 = vmatmul.mubr.msk.f32.vlgmr.msra.gmra.mxu1 %vm563_vm2, %v1339_v44 }
 0x7d0   : > { %v2550_v45 = vpop.f32.mrf.mxu0  ;;  %2580 = vmatprep.mubr.msk.f32.mxu1 %vm2758_vm1, %v2757_v3 }
 0x7d6   : > { %v1489_v46 = vpop.f32.mrf.mxu0 }
 0x7d7   : > { %2579 = vmatpush3.msra.mxu1 %v1489_v46 }
 0x7d8   : > { %v2572_v47 = vpop.f32.mrf.mxu0  ;;  %2588 = vmatprep.subr.mxu1 %v2757_v3 }
 0x88f   : > { %v1567_v50 = vpop.f32.mrf.mxu1 }
 0x890   : > { %v1568_v51 = vadd.f32 %v2329_v49, %v1567_v50 }
 0x891   : > { %v2577_v52 = vpop.f32.mrf.mxu1 }
 0x892   : > { %v1571_v53 = vadd.f32 %v1568_v51, %v2986_v48 }
 0x894   : > { %v1572_v54 = vsel %vm563_vm2, %v1571_v53, -inf }
 0x895   : > { %1573 = vmax.xlane.f32.xlu1 %v1572_v54 }
 0x91e   : > { %v1574_v55 = vpop.xlane.xlu1 %1573 }
 0x91f   : > { %v1575_v56 = vsub.f32 %v1571_v53, %v1574_v55 }
 0x921   : > { %v1576_v57 = vmul.f32 1.442695, %v1575_v56 }
 0x923   : > { %2687 = vpow2.f32 %v1576_v57 }
 0x930   : > { %v2688_v58 = vpop.eup %2687 }
 0x931   : > { %v1578_v59 = vsel %vm563_vm2, %v2688_v58, 0.0 }
 0x932   : > { %1579 = vadd.xlane.f32.xlu0 %v1578_v59 }
 0x9bb   : > { %v1580_v61 = vpop.xlane.xlu0 %1579 }
 0x9bc   : > { %2689 = vrcp.f32 %v1580_v61 }
 0x9c9   : > { %v2690_v62 = vpop.eup %2689 }
 0x9ca   : > { %v1582_v63 = vmul.f32 %v2690_v62, %v2688_v58 }
 0x9cc   : > { %2581 = vmatmul.mubr.msk.f32.vlgmr.msra.gmra.mxu1 %vm563_vm2, %v1582_v63 }
 0x9cd   : > { %2589 = vmatpush3.msra.mxu1 %v2338_v0  ;;  %2596 = vmatprep.mubr.msk.f32.mxu1 %vm2758_vm1, %v2757_v3 }
 0x9ce   : > { %2590 = vmatprep.subr.mxu1 %v2757_v3 }
 0x9cf   : > { %2591 = vmatpush3.msra.mxu1 %v2337_v1 }
 0x9d0   : > { %2592 = vmatprep.subr.mxu1 %v2757_v3 }
 0x9d1   : > { %2593 = vmatpush3.msra.mxu1 %v2336_v2 }
 0x9d2   : > { %2594 = vmatprep.subr.mxu1 %v2757_v3 }
 0x9d3   : > { %2595 = vmatpush3.msra.mxu1 %v2335_v4 }
 0x9d4   : > { %2597 = vmatmul.mubr.msk.f32.vlgmr.msra.gmra.mxu1 %vm317_vm0, %v2903_v18  ;;  %2610 = vmatprep.subr.mxu1 %v2757_v3 }
 0x9d5   : > { %2611 = vmatpush3.msra.mxu1 %v2348_v5  ;;  %2618 = vmatprep.mubr.msk.f32.mxu1 %vm2758_vm1, %v2757_v3 }
 0x9d6   : > { %2612 = vmatprep.subr.mxu1 %v2757_v3 }
 0x9d7   : > { %2613 = vmatpush3.msra.mxu1 %v2347_v6 }
 0x9d8   : > { %2614 = vmatprep.subr.mxu1 %v2757_v3 }
 0x9d9   : > { %2615 = vmatpush3.msra.mxu1 %v2346_v7 }
 0x9da   : > { %2616 = vmatprep.subr.mxu1 %v2757_v3 }
 0x9db   : > { %2617 = vmatpush3.msra.mxu1 %v2345_v8 }
 0x9dc   : > { %2619 = vmatmul.mubr.msk.f32.vlgmr.msra.gmra.mxu1 %vm317_vm0, %v2903_v18  ;;  %2631 = vmatprep.subr.mxu1 %v2757_v3 }
 0x9dd   : > { %2633 = vmatprep.mubr.msk.f32.mxu1 %vm2758_vm1, %v2757_v3  ;;  %2632 = vmatpush3.msra.mxu1 %v2354_v35 }
 0xa8c   : > { %v1652_v10 = vpop.f32.mrf.mxu1 }
 0xa8d   : > { %2586 = vmatmul.mubr.msk.f32.vlgmr.msra.gmra.mxu0 %vm563_vm2, %v1652_v10 }
 0xa8e   : > { %2600 = vmatpush3.msra.mxu0 %v2343_v9  ;;  %v2582_v12 = vpop.f32.mrf.mxu1  ;;  %2607 = vmatprep.mubr.msk.f32.mxu0 %vm2758_vm1, %v2757_v3 }
 0xa8f   : > { %2601 = vmatprep.subr.mxu0 %v2757_v3 }
 0xa90   : > { %2602 = vmatpush3.msra.mxu0 %v2342_v11 }
 0xa91   : > { %2603 = vmatprep.subr.mxu0 %v2757_v3 }
 0xa92   : > { %2604 = vmatpush3.msra.mxu0 %v2341_v13 }
 0xa93   : > { %2605 = vmatprep.subr.mxu0 %v2757_v3 }
 0xa94   : > { %v1803_v15 = vpop.f32.mrf.mxu1  ;;  %2606 = vmatpush3.msra.mxu0 %v2340_v14 }
 0xa95   : > { %2608 = vmatmul.mubr.msk.f32.vlgmr.msra.gmra.mxu0 %vm317_vm0, %v2903_v18  ;;  %2621 = vmatprep.subr.mxu0 %v2757_v3  ;;  %v2350_v18 = vld [vmem:[%s3249_s1 + $0x18] sm:$0xff] }
 0xa96   : > { %v2598_v16 = vpop.f32.mrf.mxu1  ;;  %2623 = vmatprep.mubr.msk.f32.mxu0 %vm2758_vm1, %v2757_v3 }
 0xa9c   : > { %v1953_v17 = vpop.f32.mrf.mxu1 }
 0xa9e   : > { %v2620_v19 = vpop.f32.mrf.mxu1 }
 0xb4d   : > { %v1727_v21 = vpop.f32.mrf.mxu0 }
 0xb4e   : > { %v1731_v22 = vadd.f32 %v1727_v21, %v1265_v20 }
 0xb4f   : > { %v2587_v23 = vpop.f32.mrf.mxu0 }
 0xb55   : > { %v1878_v24 = vpop.f32.mrf.mxu0 }
 0xb56   : > { %2622 = vmatpush3.xpose.msk.msra.mxu0 %vm563_vm2, %v1878_v24 }
 0xb57   : > { %v2609_v25 = vpop.f32.mrf.mxu0  ;;  %2626 = vmatprep.subr.mxu0 %v2757_v3 }
 0xb59   : > { %2624 = vmatmul.mubr.msk.f32.vlgmr.msra.gmra.mxu0 %vm563_vm2, %v1803_v15 }
 0xb5a   : > { %2627 = vmatpush3.msra.mxu0 %v1953_v17  ;;  %2628 = vmatprep.mubr.msk.f32.mxu0 %vm2758_vm1, %v2757_v3 }
 0xc19   : > { %v2031_v26 = vpop.f32.mrf.mxu0 }
 0xc1a   : > { %v2032_v27 = vadd.f32 %v2350_v18, %v2031_v26 }
 0xc1b   : > { %v2625_v28 = vpop.f32.mrf.mxu0 }
 0xc1c   : > { %v2035_v29 = vadd.f32 %v2032_v27, %v2986_v48 }
 0xc1e   : > { %v2036_v30 = vsel %vm563_vm2, %v2035_v29, -inf }
 0xc1f   : > { %2037 = vmax.xlane.f32.xlu1 %v2036_v30 }
 0xca8   : > { %v2038_v31 = vpop.xlane.xlu1 %2037 }
 0xca9   : > { %v2039_v32 = vsub.f32 %v2035_v29, %v2038_v31 }
 0xcab   : > { %v2040_v33 = vmul.f32 1.442695, %v2039_v32 }
 0xcad   : > { %2691 = vpow2.f32 %v2040_v33 }
 0xcba   : > { %v2692_v34 = vpop.eup %2691 }
 0xcbb   : > { %v2042_v3 = vsel %vm563_vm2, %v2692_v34, 0.0 }
 0xcbc   : > { %2043 = vadd.xlane.f32.xlu0 %v2042_v3 }
 0xd45   : > { %v2044_v36 = vpop.xlane.xlu0 %2043 }
 0xd46   : > { %2693 = vrcp.f32 %v2044_v36 }
 0xd53   : > { %v2694_v48 = vpop.eup %2693 }
 0xd54   : > { %v2046_v37 = vmul.f32 %v2694_v48, %v2692_v34 }
 0xd56   : > { %2629 = vmatmul.mubr.msk.f32.vlgmr.msra.gmra.mxu0 %vm563_vm2, %v2046_v37 }
 0xe16   : > { %v2116_v38 = vpop.f32.mrf.mxu0 }
 0xe17   : > { %2634 = vmatmul.mubr.msk.f32.vlgmr.msra.gmra.mxu1 %vm563_vm2, %v2116_v38 }
 0xe18   : > { %v2630_v39 = vpop.f32.mrf.mxu0 }
 0xed7   : > { %v2191_v40 = vpop.f32.mrf.mxu1 }
 0xed8   : > { %v2195_v41 = vadd.f32 %v2191_v40, %v1731_v22 }
 0xed9   : > { %v2635_v42 = vpop.f32.mrf.mxu1 }
 0xeda   : > { %2196 = vst.msk [vmem:[%s307_s12] sm:$0xff] %vm317_vm0, %v2195_v41 }
 0xedb   : > { %2708 = shalt.err (!%p2705_p3)
}
 0xedc   : > { %s2709_s24 = scalar_lea.hbm %s3212_s20, 128  ;;  %s2713_s10 = scalar_lea.hbm %s3256_s8, 256 }
 0xedd   : > { %p2710_p4 = scmp.ne.s32.totalorder %s3212_s20, %s2709_s24  ;;  %p2714_p9 = scmp.lt.s32.totalorder %s3212_s20, %s3256_s8 }
 0xede   : > { %p2715_p10 = scmp.lt.s32.totalorder %s2713_s10, %s2709_s24 }
 0xedf   : > { %p2711_p7 = pnand %p2710_p4, %p2843_p5 }
 0xee0   : > { %p2716_p11 = por %p2715_p10, %p2714_p9 }
 0xee1   : > { %p2712_p8 = pneg %p2711_p7 }
 0xee3   : > { %p2717_p12 = pnand %p2716_p11, %p2712_p8 }
 0xee5   : > { %2720 = shalt.err (!%p2717_p12)
}
 0xee6   : > { %2636 = dma.vmem_to_hbm [thread:$0]  (%p2843_p5), %s2212_s13, 128, %s3212_s20, %s2198_s17  }
 0xee7 PF: > { %p2642_p13 = scmp.ge.s32.totalorder %s2755_s30, 2  ;;  %s2223_s19 = sand.u32 1, %s2743_s27  }
 0xee8   : > { %s2224_s21 = scalar_lea.sflag [#allocation3], %s2223_s19 }
 0xee9   : > { %p2639_p0 = pnand %p2642_p13, %p2847_p6 }
 0xeeb   : > { %p2640_p1 = pneg %p2639_p0 }
 0xeed   : > { %2738 = dma.done.wait (%p2640_p1), %s2224_s21, 128  }
 0xeee   : > { %2740 = vsyncadd (%p2640_p1), %s2224_s21, 4294967168  ;;  %p18_p2 = scmp.ge.s32.totalorder %s2830_s11, 4   ;;  %s3259_s27 = smov %s2747_s28 }
 0xeef   : > { %s3260_s28 = smov %s2751_s29  ;;  %s3261_s29 = smov %s2841_s14 }
 0xef0   : > { %s3262_s30 = smov %s2830_s11  ;;  %20 = sbr.rel (!%p18_p2) target bundleno = 3 (0x3), region = 105 }
 0xef5   :  { %2229 = vsyncpa [#allocation3], 1 }
 0xef6   :  { %2231 = vsyncpa [#allocation3 + $0x1], 1 }

</bundles_post_ra>
